<compile_context>
chip_gen: v5e
topology: v5e:2x2
jax: 0.10.0
libtpu: 0.0.40
codegen_flags: <defaults>
</compile_context>

<pallas_src>
import functools

import jax
import jax.numpy as jnp
import numpy as np
from jax.experimental import pallas as pl
from jax.experimental.pallas import tpu as pltpu

LANE = 128      # TPU lane width — keep last dims multiples of this
SUBLANE = 8     # f32 sublane tile — keep batch a multiple of this


def _round_up(n, m):
    return ((n + m - 1) // m) * m


def _pad2d(a, rows, cols, dtype=None):
    r, c = a.shape
    out = jnp.pad(a, ((0, rows - r), (0, cols - c)))
    return out.astype(dtype) if dtype is not None else out


# ----------------------------------------------------------------------------
# Fused kernel: entire VAE forward in one body (per batch tile)
# ----------------------------------------------------------------------------
def _fused_vae_kernel(x_ref, eps_ref, *rest,
                      n_enc: int, n_dec: int,
                      enc_lanes: tuple, dec_lanes: tuple, lat_lane: int):
    """Ref layout after (x, eps):
        enc hidden W * n_enc, W_head, dec W * n_dec, bias_buf,
        x_rec_out, mu_out, logvar_out
    Weights are bf16 lane-dense; bias_buf is f32 (n_layers, max_lane) with one
    row per layer in network order. All math accumulates in f32.
    """
    enc_w = rest[:n_enc]
    w_head_ref = rest[n_enc]
    dec_w = rest[n_enc + 1:n_enc + 1 + n_dec]
    b_ref = rest[n_enc + 1 + n_dec]
    x_rec_ref, mu_ref, lv_ref = rest[n_enc + 1 + n_dec + 1:]

    biases = b_ref[...]  # (n_layers, max_lane) f32, loaded once

    def dense(h, w_ref, row, out_lane):
        w = w_ref[...]                                   # bf16 weight tile
        y = jnp.dot(h.astype(w.dtype), w,
                    preferred_element_type=jnp.float32)  # f32 accumulate
        return y + biases[row:row + 1, :out_lane]        # f32 bias add

    # ---- encoder hidden layers (Linear + ReLU), unrolled at trace time ----
    h = x_ref[...]
    row = 0
    for i in range(n_enc):
        h = jnp.maximum(dense(h, enc_w[i], row, enc_lanes[i]), 0.0)
        row += 1

    # ---- single [mu | log_var] head: one N = 2*lat_lane MXU pass ----
    head = dense(h, w_head_ref, row, 2 * lat_lane)
    row += 1
    mu = head[:, :lat_lane]                 # static lane-aligned slices
    lv = head[:, lat_lane:2 * lat_lane]

    # ---- reparameterize: z = mu + eps * exp(0.5 * log_var) (VPU + EUP, f32) --
    z = mu + eps_ref[...] * jnp.exp(0.5 * lv)

    # ---- decoder (last layer has no ReLU) ----
    h = z
    for i in range(n_dec):
        h = dense(h, dec_w[i], row, dec_lanes[i])
        row += 1
        if i < n_dec - 1:
            h = jnp.maximum(h, 0.0)

    x_rec_ref[...] = h.astype(x_rec_ref.dtype)
    mu_ref[...] = mu.astype(mu_ref.dtype)
    lv_ref[...] = lv.astype(lv_ref.dtype)


# ----------------------------------------------------------------------------
# One-time parameter prep (hoisted out of the forward path)
# ----------------------------------------------------------------------------
def prepare_vae_params(enc_params, dec_params, latent_dim,
                       weight_dtype=jnp.bfloat16):
    """enc_params / dec_params: lists of UNPADDED (W[in,out], b[1,out]) in f32,
    matching the PyTorch Linear stack. Returns pre-padded / pre-split /
    pre-cast, lane-dense parameters ready for vae_forward."""
    lat_lane = _round_up(latent_dim, LANE)
    input_dim = enc_params[0][0].shape[0]
    in_lane = _round_up(input_dim, LANE)

    enc_hidden = enc_params[:-1]
    w_last, b_last = enc_params[-1]
    hid_lane = _round_up(w_last.shape[0], LANE)

    enc_w, enc_lanes, bias_rows = [], [], []
    for w, b in enc_hidden:
        ip, op = _round_up(w.shape[0], LANE), _round_up(w.shape[1], LANE)
        enc_w.append(_pad2d(w, ip, op, weight_dtype))
        enc_lanes.append(op)
        bias_rows.append(_pad2d(b, 1, op))                       # f32

    # Head: columns [mu (torch.chunk first half) | log_var (second half)],
    # each half zero-padded to lat_lane lanes, fused into one weight.
    w_mu = _pad2d(w_last[:, :latent_dim], hid_lane, lat_lane)
    w_lv = _pad2d(w_last[:, latent_dim:], hid_lane, lat_lane)
    head_w = jnp.concatenate([w_mu, w_lv], axis=1).astype(weight_dtype)
    b_mu = _pad2d(b_last[:, :latent_dim], 1, lat_lane)
    b_lv = _pad2d(b_last[:, latent_dim:], 1, lat_lane)
    bias_rows.append(jnp.concatenate([b_mu, b_lv], axis=1))
    head_lane = 2 * lat_lane

    dec_w, dec_lanes = [], []
    for w, b in dec_params:
        ip, op = _round_up(w.shape[0], LANE), _round_up(w.shape[1], LANE)
        dec_w.append(_pad2d(w, ip, op, weight_dtype))
        dec_lanes.append(op)
        bias_rows.append(_pad2d(b, 1, op))

    max_lane = max([head_lane] + enc_lanes + dec_lanes)
    bias_buf = jnp.concatenate(
        [_pad2d(r, 1, max_lane) for r in bias_rows], axis=0)      # (L, max_lane)

    return dict(
        enc_w=enc_w, head_w=head_w, dec_w=dec_w, bias_buf=bias_buf,
        enc_lanes=tuple(enc_lanes), dec_lanes=tuple(dec_lanes),
        lat_lane=lat_lane, in_lane=in_lane,
        input_dim=input_dim, latent_dim=latent_dim,
    )


# ----------------------------------------------------------------------------
# Forward: pad x/eps -> single pallas_call (batch grid) -> strip padding
# ----------------------------------------------------------------------------
def vae_forward(x, eps, params):
    B = x.shape[0]
    input_dim, latent_dim = params["input_dim"], params["latent_dim"]
    in_lane, lat_lane = params["in_lane"], params["lat_lane"]
    enc_w, head_w, dec_w = params["enc_w"], params["head_w"], params["dec_w"]
    bias_buf = params["bias_buf"]
    n_enc, n_dec = len(enc_w), len(dec_w)

    # Batch tile: fill MXU rows when B allows; parallel grid axis lets Mosaic
    # shard batch tiles across v7x's two TensorCores (harmless on v5e/v6e).
    tm = min(256, _round_up(B, SUBLANE))
    Bp = _round_up(B, tm)

    x_p = _pad2d(x, Bp, in_lane)
    eps_p = _pad2d(eps, Bp, lat_lane)

    flat_inputs = [x_p, eps_p] + list(enc_w) + [head_w] + list(dec_w) + [bias_buf]

    def resident(a):  # whole array, constant block index -> stays in VMEM
        return pl.BlockSpec(a.shape, lambda i: (0, 0))

    in_specs = [
        pl.BlockSpec((tm, in_lane), lambda i: (i, 0)),     # x tile
        pl.BlockSpec((tm, lat_lane), lambda i: (i, 0)),    # eps tile
    ] + [resident(a) for a in flat_inputs[2:]]

    out_specs = (
        pl.BlockSpec((tm, in_lane), lambda i: (i, 0)),
        pl.BlockSpec((tm, lat_lane), lambda i: (i, 0)),
        pl.BlockSpec((tm, lat_lane), lambda i: (i, 0)),
    )

    # Explicit VMEM budget: double-buffered activation/output tiles +
    # resident weight stack + headroom (scoped defaults are far below physical).
    def _nbytes(a):
        return int(np.prod(a.shape)) * a.dtype.itemsize
    resident_bytes = sum(_nbytes(a) for a in flat_inputs[2:])
    tile_bytes = (tm * in_lane + tm * lat_lane) * 4
    out_bytes = (tm * in_lane + 2 * tm * lat_lane) * 4
    need = 2 * (tile_bytes + out_bytes) + 2 * resident_bytes
    vmem_limit = int(min(max(2 * need + (8 << 20), 16 << 20), 120 << 20))

    kernel = functools.partial(
        _fused_vae_kernel,
        n_enc=n_enc, n_dec=n_dec,
        enc_lanes=params["enc_lanes"], dec_lanes=params["dec_lanes"],
        lat_lane=lat_lane,
    )

    x_rec_p, mu_p, lv_p = pl.pallas_call(
        kernel,
        out_shape=(
            jax.ShapeDtypeStruct((Bp, in_lane), jnp.float32),
            jax.ShapeDtypeStruct((Bp, lat_lane), jnp.float32),
            jax.ShapeDtypeStruct((Bp, lat_lane), jnp.float32),
        ),
        grid_spec=pltpu.PrefetchScalarGridSpec(
            num_scalar_prefetch=0,
            grid=(Bp // tm,),
            in_specs=in_specs,
            out_specs=out_specs,
        ),
        compiler_params=pltpu.CompilerParams(
            dimension_semantics=("parallel",),
            vmem_limit_bytes=vmem_limit,
        ),
    )(*flat_inputs)

    # Strip padding exactly once, at the very end.
    return (x_rec_p[:B, :input_dim],
            mu_p[:B, :latent_dim],
            lv_p[:B, :latent_dim])


# ----------------------------------------------------------------------------
# Parameter construction (deterministic, PyTorch-Linear-style uniform init)
# ----------------------------------------------------------------------------
def make_mlp_params(key, dims):
    """dims = [d0, d1, ..., dL]; returns list of (W[in,out], b[1,out]) in f32."""
    params = []
    for i in range(len(dims) - 1):
        fan_in, fan_out = dims[i], dims[i + 1]
        key, kw, kb = jax.random.split(key, 3)
        bound = 1.0 / jnp.sqrt(fan_in)
        w = jax.random.uniform(kw, (fan_in, fan_out), jnp.float32, -bound, bound)
        b = jax.random.uniform(kb, (1, fan_out), jnp.float32, -bound, bound)
        params.append((w, b))
    return params


if __name__ == "__main__":
    # Small shapes consistent with the module's forward.
    batch = 8
    input_dim = 16
    hidden_dims = [32, 32]
    latent_dim = 8

    root = jax.random.PRNGKey(0)
    k_x, k_eps, k_enc, k_dec = jax.random.split(root, 4)

    x = jax.random.normal(k_x, (batch, input_dim), jnp.float32)
    # eps ~ N(0, 1), same shape as mu / std (matches torch.randn_like(std)).
    eps = jax.random.normal(k_eps, (batch, latent_dim), jnp.float32)

    # encoder: input_dim -> hidden_dims -> latent_dim * 2
    enc_params = make_mlp_params(k_enc, [input_dim] + hidden_dims + [latent_dim * 2])
    # decoder: latent_dim -> reversed(hidden_dims) -> input_dim
    dec_params = make_mlp_params(k_dec, [latent_dim] + hidden_dims[::-1] + [input_dim])

    # One-time prep: pad / split head / cast weights to bf16 / pack biases.
    prepared = prepare_vae_params(enc_params, dec_params, latent_dim)

    x_rec, mu, log_var = vae_forward(x, eps, prepared)
    jax.block_until_ready((x_rec, mu, log_var))

    assert x_rec.shape == (batch, input_dim)
    assert mu.shape == (batch, latent_dim)
    assert log_var.shape == (batch, latent_dim)

    # Reference 1: mirrors the kernel math (bf16 dot operands, f32 accumulate).
    def ref_mlp_mixed(x_, params_):
        h = x_
        for i, (w, b) in enumerate(params_):
            h = jnp.dot(h.astype(jnp.bfloat16), w.astype(jnp.bfloat16),
                        preferred_element_type=jnp.float32) + b
            if i < len(params_) - 1:
                h = jnp.maximum(h, 0.0)
        return h

    h_ref = ref_mlp_mixed(x, enc_params)
    mu_ref, lv_ref = h_ref[:, :latent_dim], h_ref[:, latent_dim:]
    z_ref = mu_ref + eps * jnp.exp(0.5 * lv_ref)
    xr_ref = ref_mlp_mixed(z_ref, dec_params)

    assert jnp.allclose(mu, mu_ref, atol=2e-3, rtol=2e-3)
    assert jnp.allclose(log_var, lv_ref, atol=2e-3, rtol=2e-3)
    assert jnp.allclose(x_rec, xr_ref, atol=2e-3, rtol=2e-3)

    # Reference 2 (sanity): full f32 math, loose tolerance (bf16 weight quant).
    def ref_mlp_f32(x_, params_):
        h = x_
        for i, (w, b) in enumerate(params_):
            h = h @ w + b
            if i < len(params_) - 1:
                h = jnp.maximum(h, 0.0)
        return h

    h32 = ref_mlp_f32(x, enc_params)
    mu32, lv32 = h32[:, :latent_dim], h32[:, latent_dim:]
    z32 = mu32 + eps * jnp.exp(0.5 * lv32)
    xr32 = ref_mlp_f32(z32, dec_params)
    assert jnp.allclose(mu, mu32, atol=5e-2, rtol=5e-2)
    assert jnp.allclose(log_var, lv32, atol=5e-2, rtol=5e-2)
    assert jnp.allclose(x_rec, xr32, atol=5e-2, rtol=5e-2)

    print("KERNEL_OK")
</pallas_src>

<mosaic_0001>
module attributes {stable_mosaic.version = 11 : i64} {
  func.func @_fused_vae_kernel(%arg0: i32, %arg1: memref<8x128xf32, #tpu.memory_space<vmem>>, %arg2: memref<8x128xf32, #tpu.memory_space<vmem>>, %arg3: memref<128x128xbf16, #tpu.memory_space<vmem>>, %arg4: memref<128x128xbf16, #tpu.memory_space<vmem>>, %arg5: memref<128x256xbf16, #tpu.memory_space<vmem>>, %arg6: memref<128x128xbf16, #tpu.memory_space<vmem>>, %arg7: memref<128x128xbf16, #tpu.memory_space<vmem>>, %arg8: memref<128x128xbf16, #tpu.memory_space<vmem>>, %arg9: memref<6x256xf32, #tpu.memory_space<vmem>>, %arg10: memref<8x128xf32, #tpu.memory_space<vmem>>, %arg11: memref<8x128xf32, #tpu.memory_space<vmem>>, %arg12: memref<8x128xf32, #tpu.memory_space<vmem>>) attributes {dimension_semantics = [#tpu.dimension_semantics<parallel>], iteration_bounds = array<i64: 1>, scalar_prefetch = 0 : i64, scratch_operands = 0 : i64, tpu.core_type = #tpu.core_type<tc>, window_params = [{transform_indices = @transform_0, window_bounds = array<i64: 8, 128>}, {transform_indices = @transform_1, window_bounds = array<i64: 8, 128>}, {pipeline_mode = #tpu.pipeline_mode<synchronous>, transform_indices = @transform_2, window_bounds = array<i64: 128, 128>}, {pipeline_mode = #tpu.pipeline_mode<synchronous>, transform_indices = @transform_3, window_bounds = array<i64: 128, 128>}, {pipeline_mode = #tpu.pipeline_mode<synchronous>, transform_indices = @transform_4, window_bounds = array<i64: 128, 256>}, {pipeline_mode = #tpu.pipeline_mode<synchronous>, transform_indices = @transform_5, window_bounds = array<i64: 128, 128>}, {pipeline_mode = #tpu.pipeline_mode<synchronous>, transform_indices = @transform_6, window_bounds = array<i64: 128, 128>}, {pipeline_mode = #tpu.pipeline_mode<synchronous>, transform_indices = @transform_7, window_bounds = array<i64: 128, 128>}, {pipeline_mode = #tpu.pipeline_mode<synchronous>, transform_indices = @transform_8, window_bounds = array<i64: 6, 256>}, {transform_indices = @transform_9, window_bounds = array<i64: 8, 128>}, {transform_indices = @transform_10, window_bounds = array<i64: 8, 128>}, {transform_indices = @transform_11, window_bounds = array<i64: 8, 128>}]} {
    %c0 = arith.constant 0 : index
    %c0_0 = arith.constant 0 : index
    %0 = vector.load %arg9[%c0, %c0_0] : memref<6x256xf32, #tpu.memory_space<vmem>>, vector<6x256xf32>
    %c0_1 = arith.constant 0 : index
    %c0_2 = arith.constant 0 : index
    %1 = vector.load %arg1[%c0_1, %c0_2] : memref<8x128xf32, #tpu.memory_space<vmem>>, vector<8x128xf32>
    %c0_3 = arith.constant 0 : index
    %c0_4 = arith.constant 0 : index
    %2 = vector.load %arg3[%c0_3, %c0_4] : memref<128x128xbf16, #tpu.memory_space<vmem>>, vector<128x128xbf16>
    %3 = arith.truncf %1 : vector<8x128xf32> to vector<8x128xbf16>
    %cst = arith.constant dense<0.000000e+00> : vector<8x128xf32>
    %4 = tpu.matmul %3, %2, %cst {dimension_numbers = #tpu.dot_dimension_numbers<[1], [0], [0], [1], [0, 0, 1, 1], [], []>} : vector<8x128xbf16>, vector<128x128xbf16>, vector<8x128xf32> -> vector<8x128xf32>
    %5 = vector.extract_strided_slice %0 {offsets = [0, 0], sizes = [1, 128], strides = [1, 1]} : vector<6x256xf32> to vector<1x128xf32>
    %6 = vector.broadcast %5 : vector<1x128xf32> to vector<8x128xf32>
    %7 = arith.addf %4, %6 : vector<8x128xf32>
    %cst_5 = arith.constant 0.000000e+00 : f32
    %8 = vector.broadcast %cst_5 : f32 to vector<8x128xf32>
    %9 = arith.maximumf %7, %8 : vector<8x128xf32>
    %c0_6 = arith.constant 0 : index
    %c0_7 = arith.constant 0 : index
    %10 = vector.load %arg4[%c0_6, %c0_7] : memref<128x128xbf16, #tpu.memory_space<vmem>>, vector<128x128xbf16>
    %11 = arith.truncf %9 : vector<8x128xf32> to vector<8x128xbf16>
    %cst_8 = arith.constant dense<0.000000e+00> : vector<8x128xf32>
    %12 = tpu.matmul %11, %10, %cst_8 {dimension_numbers = #tpu.dot_dimension_numbers<[1], [0], [0], [1], [0, 0, 1, 1], [], []>} : vector<8x128xbf16>, vector<128x128xbf16>, vector<8x128xf32> -> vector<8x128xf32>
    %13 = vector.extract_strided_slice %0 {offsets = [1, 0], sizes = [1, 128], strides = [1, 1]} : vector<6x256xf32> to vector<1x128xf32>
    %14 = vector.broadcast %13 : vector<1x128xf32> to vector<8x128xf32>
    %15 = arith.addf %12, %14 : vector<8x128xf32>
    %cst_9 = arith.constant 0.000000e+00 : f32
    %16 = vector.broadcast %cst_9 : f32 to vector<8x128xf32>
    %17 = arith.maximumf %15, %16 : vector<8x128xf32>
    %c0_10 = arith.constant 0 : index
    %c0_11 = arith.constant 0 : index
    %18 = vector.load %arg5[%c0_10, %c0_11] : memref<128x256xbf16, #tpu.memory_space<vmem>>, vector<128x256xbf16>
    %19 = arith.truncf %17 : vector<8x128xf32> to vector<8x128xbf16>
    %cst_12 = arith.constant dense<0.000000e+00> : vector<8x256xf32>
    %20 = tpu.matmul %19, %18, %cst_12 {dimension_numbers = #tpu.dot_dimension_numbers<[1], [0], [0], [1], [0, 0, 1, 1], [], []>} : vector<8x128xbf16>, vector<128x256xbf16>, vector<8x256xf32> -> vector<8x256xf32>
    %21 = vector.extract_strided_slice %0 {offsets = [2, 0], sizes = [1, 256], strides = [1, 1]} : vector<6x256xf32> to vector<1x256xf32>
    %22 = vector.broadcast %21 : vector<1x256xf32> to vector<8x256xf32>
    %23 = arith.addf %20, %22 : vector<8x256xf32>
    %24 = vector.extract_strided_slice %23 {offsets = [0, 0], sizes = [8, 128], strides = [1, 1]} : vector<8x256xf32> to vector<8x128xf32>
    %25 = vector.extract_strided_slice %23 {offsets = [0, 128], sizes = [8, 128], strides = [1, 1]} : vector<8x256xf32> to vector<8x128xf32>
    %c0_13 = arith.constant 0 : index
    %c0_14 = arith.constant 0 : index
    %26 = vector.load %arg2[%c0_13, %c0_14] : memref<8x128xf32, #tpu.memory_space<vmem>>, vector<8x128xf32>
    %cst_15 = arith.constant 5.000000e-01 : f32
    %27 = vector.broadcast %cst_15 : f32 to vector<8x128xf32>
    %28 = arith.mulf %27, %25 : vector<8x128xf32>
    %29 = math.exp %28 : vector<8x128xf32>
    %30 = arith.mulf %26, %29 : vector<8x128xf32>
    %31 = arith.addf %24, %30 : vector<8x128xf32>
    %c0_16 = arith.constant 0 : index
    %c0_17 = arith.constant 0 : index
    %32 = vector.load %arg6[%c0_16, %c0_17] : memref<128x128xbf16, #tpu.memory_space<vmem>>, vector<128x128xbf16>
    %33 = arith.truncf %31 : vector<8x128xf32> to vector<8x128xbf16>
    %cst_18 = arith.constant dense<0.000000e+00> : vector<8x128xf32>
    %34 = tpu.matmul %33, %32, %cst_18 {dimension_numbers = #tpu.dot_dimension_numbers<[1], [0], [0], [1], [0, 0, 1, 1], [], []>} : vector<8x128xbf16>, vector<128x128xbf16>, vector<8x128xf32> -> vector<8x128xf32>
    %35 = vector.extract_strided_slice %0 {offsets = [3, 0], sizes = [1, 128], strides = [1, 1]} : vector<6x256xf32> to vector<1x128xf32>
    %36 = vector.broadcast %35 : vector<1x128xf32> to vector<8x128xf32>
    %37 = arith.addf %34, %36 : vector<8x128xf32>
    %cst_19 = arith.constant 0.000000e+00 : f32
    %38 = vector.broadcast %cst_19 : f32 to vector<8x128xf32>
    %39 = arith.maximumf %37, %38 : vector<8x128xf32>
    %c0_20 = arith.constant 0 : index
    %c0_21 = arith.constant 0 : index
    %40 = vector.load %arg7[%c0_20, %c0_21] : memref<128x128xbf16, #tpu.memory_space<vmem>>, vector<128x128xbf16>
    %41 = arith.truncf %39 : vector<8x128xf32> to vector<8x128xbf16>
    %cst_22 = arith.constant dense<0.000000e+00> : vector<8x128xf32>
    %42 = tpu.matmul %41, %40, %cst_22 {dimension_numbers = #tpu.dot_dimension_numbers<[1], [0], [0], [1], [0, 0, 1, 1], [], []>} : vector<8x128xbf16>, vector<128x128xbf16>, vector<8x128xf32> -> vector<8x128xf32>
    %43 = vector.extract_strided_slice %0 {offsets = [4, 0], sizes = [1, 128], strides = [1, 1]} : vector<6x256xf32> to vector<1x128xf32>
    %44 = vector.broadcast %43 : vector<1x128xf32> to vector<8x128xf32>
    %45 = arith.addf %42, %44 : vector<8x128xf32>
    %cst_23 = arith.constant 0.000000e+00 : f32
    %46 = vector.broadcast %cst_23 : f32 to vector<8x128xf32>
    %47 = arith.maximumf %45, %46 : vector<8x128xf32>
    %c0_24 = arith.constant 0 : index
    %c0_25 = arith.constant 0 : index
    %48 = vector.load %arg8[%c0_24, %c0_25] : memref<128x128xbf16, #tpu.memory_space<vmem>>, vector<128x128xbf16>
    %49 = arith.truncf %47 : vector<8x128xf32> to vector<8x128xbf16>
    %cst_26 = arith.constant dense<0.000000e+00> : vector<8x128xf32>
    %50 = tpu.matmul %49, %48, %cst_26 {dimension_numbers = #tpu.dot_dimension_numbers<[1], [0], [0], [1], [0, 0, 1, 1], [], []>} : vector<8x128xbf16>, vector<128x128xbf16>, vector<8x128xf32> -> vector<8x128xf32>
    %51 = vector.extract_strided_slice %0 {offsets = [5, 0], sizes = [1, 128], strides = [1, 1]} : vector<6x256xf32> to vector<1x128xf32>
    %52 = vector.broadcast %51 : vector<1x128xf32> to vector<8x128xf32>
    %53 = arith.addf %50, %52 : vector<8x128xf32>
    %c0_27 = arith.constant 0 : index
    %c0_28 = arith.constant 0 : index
    %54 = vector.load %arg10[%c0_27, %c0_28] : memref<8x128xf32, #tpu.memory_space<vmem>>, vector<8x128xf32>
    tpu.vector_store %arg10[%c0_27, %c0_28], %53 {strides = array<i32>} : memref<8x128xf32, #tpu.memory_space<vmem>>, vector<8x128xf32>,
    %c0_29 = arith.constant 0 : index
    %c0_30 = arith.constant 0 : index
    %55 = vector.load %arg11[%c0_29, %c0_30] : memref<8x128xf32, #tpu.memory_space<vmem>>, vector<8x128xf32>
    tpu.vector_store %arg11[%c0_29, %c0_30], %24 {strides = array<i32>} : memref<8x128xf32, #tpu.memory_space<vmem>>, vector<8x128xf32>,
    %c0_31 = arith.constant 0 : index
    %c0_32 = arith.constant 0 : index
    %56 = vector.load %arg12[%c0_31, %c0_32] : memref<8x128xf32, #tpu.memory_space<vmem>>, vector<8x128xf32>
    tpu.vector_store %arg12[%c0_31, %c0_32], %25 {strides = array<i32>} : memref<8x128xf32, #tpu.memory_space<vmem>>, vector<8x128xf32>,
    return
  }
  func.func @transform_0(%arg0: i32) -> (i32, i32) {
    %c0_i32 = arith.constant 0 : i32
    %c0_i32_0 = arith.constant 0 : i32
    return %arg0, %c0_i32 : i32, i32
  }
  func.func @transform_1(%arg0: i32) -> (i32, i32) {
    %c0_i32 = arith.constant 0 : i32
    %c0_i32_0 = arith.constant 0 : i32
    return %arg0, %c0_i32 : i32, i32
  }
  func.func @transform_2(%arg0: i32) -> (i32, i32) {
    %c0_i32 = arith.constant 0 : i32
    %c0_i32_0 = arith.constant 0 : i32
    %c0_i32_1 = arith.constant 0 : i32
    return %c0_i32, %c0_i32_0 : i32, i32
  }
  func.func @transform_3(%arg0: i32) -> (i32, i32) {
    %c0_i32 = arith.constant 0 : i32
    %c0_i32_0 = arith.constant 0 : i32
    %c0_i32_1 = arith.constant 0 : i32
    return %c0_i32, %c0_i32_0 : i32, i32
  }
  func.func @transform_4(%arg0: i32) -> (i32, i32) {
    %c0_i32 = arith.constant 0 : i32
    %c0_i32_0 = arith.constant 0 : i32
    %c0_i32_1 = arith.constant 0 : i32
    return %c0_i32, %c0_i32_0 : i32, i32
  }
  func.func @transform_5(%arg0: i32) -> (i32, i32) {
    %c0_i32 = arith.constant 0 : i32
    %c0_i32_0 = arith.constant 0 : i32
    %c0_i32_1 = arith.constant 0 : i32
    return %c0_i32, %c0_i32_0 : i32, i32
  }
  func.func @transform_6(%arg0: i32) -> (i32, i32) {
    %c0_i32 = arith.constant 0 : i32
    %c0_i32_0 = arith.constant 0 : i32
    %c0_i32_1 = arith.constant 0 : i32
    return %c0_i32, %c0_i32_0 : i32, i32
  }
  func.func @transform_7(%arg0: i32) -> (i32, i32) {
    %c0_i32 = arith.constant 0 : i32
    %c0_i32_0 = arith.constant 0 : i32
    %c0_i32_1 = arith.constant 0 : i32
    return %c0_i32, %c0_i32_0 : i32, i32
  }
  func.func @transform_8(%arg0: i32) -> (i32, i32) {
    %c0_i32 = arith.constant 0 : i32
    %c0_i32_0 = arith.constant 0 : i32
    %c0_i32_1 = arith.constant 0 : i32
    return %c0_i32, %c0_i32_0 : i32, i32
  }
  func.func @transform_9(%arg0: i32) -> (i32, i32) {
    %c0_i32 = arith.constant 0 : i32
    %c0_i32_0 = arith.constant 0 : i32
    return %arg0, %c0_i32 : i32, i32
  }
  func.func @transform_10(%arg0: i32) -> (i32, i32) {
    %c0_i32 = arith.constant 0 : i32
    %c0_i32_0 = arith.constant 0 : i32
    return %arg0, %c0_i32 : i32, i32
  }
  func.func @transform_11(%arg0: i32) -> (i32, i32) {
    %c0_i32 = arith.constant 0 : i32
    %c0_i32_0 = arith.constant 0 : i32
    return %arg0, %c0_i32 : i32, i32
  }
}

</mosaic_0001>

<bundles_post_ra>
// kernel: tpu_custom_call.1
= control target key start
LH: loop header
LB: loop body
LE: loop exit
PB: predicated region body
PF: predicated region fallthrough
CT: control target
= control target key end

     0   :  { %17 = vsyncpa [#allocation3], 0  ;;  %s1494_s0 = inlined_call_operand.hbm [shape: f32[8,128], index: 0, kind: input, shape index: {}]   ;;  %s1495_s1 = inlined_call_operand.hbm [shape: f32[8,128], index: 1, kind: input, shape index: {}]   ;;  %s1496_s2 = inlined_call_operand.hbm [shape: bf16[128,128], index: 2, kind: input, shape index: {}]   ;;  %s1497_s3 = inlined_call_operand.hbm [shape: bf16[128,128], index: 3, kind: input, shape index: {}]   ;;  %s1498_s4 = inlined_call_operand.hbm [shape: bf16[128,256], index: 4, kind: input, shape index: {}]   ;;  %s1499_s5 = inlined_call_operand.hbm [shape: bf16[128,128], index: 5, kind: input, shape index: {}]   ;;  %s1500_s6 = inlined_call_operand.hbm [shape: bf16[128,128], index: 6, kind: input, shape index: {}]   ;;  %s1501_s7 = inlined_call_operand.hbm [shape: bf16[128,128], index: 7, kind: input, shape index: {}]   ;;  %s1502_s8 = inlined_call_operand.hbm [shape: f32[6,256], index: 8, kind: input, shape index: {}]   ;;  %s1503_s9 = inlined_call_operand.hbm [shape: f32[8,128], index: 9, kind: output, shape index: {0}]   ;;  %s1504_s10 = inlined_call_operand.hbm [shape: f32[8,128], index: 10, kind: output, shape index: {1}]   ;;  %s1505_s11 = inlined_call_operand.hbm [shape: f32[8,128], index: 11, kind: output, shape index: {2}]  }
   0x1   :  { %18 = vsyncpa [#allocation6], 0 }
   0x2   :  { %19 = vsyncpa [#allocation9], 0 }
   0x3   :  { %20 = vsyncpa [#allocation12], 0 }
   0x4   :  { %21 = vsyncpa [#allocation15], 0 }
   0x5   :  { %22 = vsyncpa [#allocation4], 0  ;;  %s40_s19 = sshll.u32 %s1495_s1, 4  ;;  %s41_s19 = int_to_ptr.hbm [resolvable:$true] %s40_s19 }
   0x6   :  { %23 = vsyncpa [#allocation19], 0  ;;  %s1359_s20 = smov [#allocation5]   ;;  %s63_s24 = sshll.u32 %s1497_s3, 4  ;;  %s64_s24 = int_to_ptr.hbm [resolvable:$true] %s63_s24 }
   0x7   :  { %s42_s21 = sshll.u32 %s1359_s20, 4  ;;  %s1360_s25 = smov [#allocation8]   ;;  %s43_s21 = int_to_ptr.vmem [resolvable:$true] %s42_s21 }
   0x8   :  { %45 = dma.hbm_to_vmem [thread:$0]  %s41_s19, 128, %s43_s21, [#allocation6]  }
   0x9   :  { %s65_s26 = sshll.u32 %s1360_s25, 4  ;;  %s89_s29 = sshll.u32 %s1499_s5, 4  ;;  %s66_s26 = int_to_ptr.vmem [resolvable:$true] %s65_s26  ;;  %s90_s29 = int_to_ptr.hbm [resolvable:$true] %s89_s29 }
   0xa   :  { %s1361_s1 = smov 64   ;;  %s1362_s30 = smov 4  }
   0xb   :  { %71 = dma.hbm_to_vmem [thread:$0]  %s64_s24, 1024, %s66_s26, [#allocation9], %s1361_s1, %s1361_s1, %s1362_s30  }
   0xc   :  { %s115_s14 = sshll.u32 %s1501_s7, 4  ;;  %s1363_s3 = smov [#allocation11]   ;;  %s116_s14 = int_to_ptr.hbm [resolvable:$true] %s115_s14 }
   0xd   :  { %s91_s15 = sshll.u32 %s1363_s3, 4  ;;  %s1364_s5 = smov [#allocation14]   ;;  %s92_s15 = int_to_ptr.vmem [resolvable:$true] %s91_s15 }
   0xe   :  { %97 = dma.hbm_to_vmem [thread:$0]  %s90_s29, 1024, %s92_s15, [#allocation12], %s1361_s1, %s1361_s1, %s1362_s30  }
   0xf   :  { %s117_s16 = sshll.u32 %s1364_s5, 4  ;;  %s29_s19 = sshll.u32 %s1494_s0, 4  ;;  %s118_s16 = int_to_ptr.vmem [resolvable:$true] %s117_s16  ;;  %s30_s19 = int_to_ptr.hbm [resolvable:$true] %s29_s19 }
  0x10   :  { %123 = dma.hbm_to_vmem [thread:$0]  %s116_s14, 1024, %s118_s16, [#allocation15], %s1361_s1, %s1361_s1, %s1362_s30  }
  0x11   :  { %s50_s21 = sshll.u32 %s1496_s2, 4  ;;  %s1365_s22 = smov [#allocation2]   ;;  %s51_s21 = int_to_ptr.hbm [resolvable:$true] %s50_s21 }
  0x12   :  { %s31_s23 = sshll.u32 %s1365_s22, 4  ;;  %s1366_s24 = smov [#allocation7]   ;;  %s32_s23 = int_to_ptr.vmem [resolvable:$true] %s31_s23 }
  0x13   :  { %34 = dma.hbm_to_vmem [thread:$0]  %s30_s19, 128, %s32_s23, [#allocation3]  }
  0x14   :  { %s52_s25 = sshll.u32 %s1366_s24, 4  ;;  %s76_s0 = sshll.u32 %s1498_s4, 4  ;;  %s53_s25 = int_to_ptr.vmem [resolvable:$true] %s52_s25  ;;  %s77_s0 = int_to_ptr.hbm [resolvable:$true] %s76_s0 }
  0x15   :  { %58 = dma.hbm_to_vmem [thread:$0]  %s51_s21, 1024, %s53_s25, [#allocation6], %s1361_s1, %s1361_s1, %s1362_s30  }
  0x16   :  { %s1367_s28 = smov [#allocation10]   ;;  %s102_s13 = sshll.u32 %s1500_s6, 4  ;;  %s103_s13 = int_to_ptr.hbm [resolvable:$true] %s102_s13 }
  0x17   :  { %s78_s29 = sshll.u32 %s1367_s28, 4  ;;  %s1368_s14 = smov 128   ;;  %s79_s29 = int_to_ptr.vmem [resolvable:$true] %s78_s29 }
  0x18   :  { %s1369_s3 = smov 8   ;;  %s1370_s15 = smov [#allocation13]  }
  0x19   :  { %84 = dma.hbm_to_vmem [thread:$0]  %s77_s0, 2048, %s79_s29, [#allocation9], %s1368_s14, %s1368_s14, %s1369_s3  }
  0x1a   :  { %s104_s5 = sshll.u32 %s1370_s15, 4  ;;  %s129_s17 = sshll.u32 %s1502_s8, 4  ;;  %s105_s5 = int_to_ptr.vmem [resolvable:$true] %s104_s5  ;;  %s130_s17 = int_to_ptr.hbm [resolvable:$true] %s129_s17 }
  0x1b   :  { %110 = dma.hbm_to_vmem [thread:$0]  %s103_s13, 1024, %s105_s5, [#allocation12], %s1361_s1, %s1361_s1, %s1362_s30  }
  0x1c   :  { %s1371_s18 = smov [#allocation16]  }
  0x1d   :  { %s131_s19 = sshll.u32 %s1371_s18, 4  ;;  %s132_s19 = int_to_ptr.vmem [resolvable:$true] %s131_s19 }
  0x1e   :  { %134 = dma.hbm_to_vmem [thread:$0]  %s130_s17, 256, %s132_s19, [#allocation15]  }
  0x1f   :  { %1345 = dma.done.wait [#allocation3], 128  }
  0x20   :  { %1346 = vsyncadd [#allocation3], 4294967168 }
  0x21   :  { %1347 = dma.done.wait [#allocation6], 1152  }
  0x22   :  { %1348 = vsyncadd [#allocation6], 4294966144 }
  0x23   :  { %1349 = dma.done.wait [#allocation9], 3072  }
  0x24   :  { %1350 = vsyncadd [#allocation9], 4294964224 }
  0x25   :  { %1351 = dma.done.wait [#allocation12], 2048  }
  0x26   :  { %1352 = vsyncadd [#allocation12], 4294965248 }
  0x27   :  { %1353 = dma.done.wait [#allocation15], 1280  }
  0x28   :  { %1354 = vsyncadd [#allocation15], 4294966016  ;;  %v990_v0 = vld [vmem:[#allocation7 + $0x38] sm:$0xff]  ;;  %v989_v1 = vld [vmem:[#allocation7 + $0x30] sm:$0xff]  ;;  %s725_s1 = sshll.u32 %s1504_s10, 4  ;;  %s1372_s30 = smov [#allocation18]   ;;  %s726_s1 = int_to_ptr.hbm [resolvable:$true] %s725_s1 }
  0x29   :  { %240 = vmatpush.bf16.msra.mxu0 %v990_v0  ;;  %v998_v2 = vld [vmem:[#allocation8 + $0x38] sm:$0xff]  ;;  %v997_v3 = vld [vmem:[#allocation8 + $0x30] sm:$0xff]  ;;  %v988_v4 = vld [vmem:[#allocation7 + $0x28] sm:$0xff]  ;;  %s723_s7 = sshll.u32 %s1372_s30, 4  ;;  %s1373_s20 = smov [#allocation20]   ;;  %s724_s7 = int_to_ptr.vmem [resolvable:$true] %s723_s7 }
  0x2a   :  { %320 = vmatpush.bf16.msra.mxu1 %v998_v2  ;;  %v996_v5 = vld [vmem:[#allocation8 + $0x28] sm:$0xff]  ;;  %v987_v6 = vld [vmem:[#allocation7 + $0x20] sm:$0xff]  ;;  %v986_v8 = vld [vmem:[#allocation7 + $0x18] sm:$0xff]  ;;  %s734_s21 = sshll.u32 %s1373_s20, 4  ;;  %s736_s24 = sshll.u32 %s1505_s11, 4  ;;  %s735_s21 = int_to_ptr.vmem [resolvable:$true] %s734_s21  ;;  %s737_s24 = int_to_ptr.hbm [resolvable:$true] %s736_s24 }
  0x2b   :  { %v995_v7 = vld [vmem:[#allocation8 + $0x20] sm:$0xff]  ;;  %v994_v9 = vld [vmem:[#allocation8 + $0x18] sm:$0xff]  ;;  %v985_v10 = vld [vmem:[#allocation7 + $0x10] sm:$0xff]  ;;  %s1374_s25 = smov [#allocation17]   ;;  %s714_s0 = sshll.u32 %s1503_s9, 4  ;;  %s715_s0 = int_to_ptr.hbm [resolvable:$true] %s714_s0 }
  0x2c   :  { %v993_v11 = vld [vmem:[#allocation8 + $0x10] sm:$0xff]  ;;  %v984_v12 = vld [vmem:[#allocation7 + $0x8] sm:$0xff]  ;;  %v983_v13 = vld [vmem:[#allocation7] sm:$0xff]  ;;  %s712_s26 = sshll.u32 %s1374_s25, 4  ;;  %s713_s26 = int_to_ptr.vmem [resolvable:$true] %s712_s26 }
  0x2d   :  { %241 = vmatpush.bf16.msra.mxu0 %v989_v1  ;;  %v173_v14 = vld [vmem:[#allocation2] sm:$0xff]  ;;  %v992_v16 = vld [vmem:[#allocation8 + $0x8] sm:$0xff]  ;;  %v991_v17 = vld [vmem:[#allocation8] sm:$0xff] }
  0x2e   :  { %321 = vmatpush.bf16.msra.mxu1 %v997_v3  ;;  %v190_v15 = vpack.c.bf16 %v173_v14, %v173_v14  ;;  %v881_v18 = vld [vmem:[#allocation10 + $0x70] sm:$0xf]  ;;  %v1014_v19 = vld [vmem:[#allocation10 + $0x74] sm:$0xf0]  ;;  %v1013_v20 = vld [vmem:[#allocation10 + $0x74] sm:$0xf] }
  0x2f   :  { %v882_v21 = vor.u32 %v1014_v19, %v881_v18  ;;  %v883_v22 = vld [vmem:[#allocation10 + $0x78] sm:$0xf0]  ;;  %v873_v23 = vld [vmem:[#allocation10 + $0x60] sm:$0xf]  ;;  %v1012_v24 = vld [vmem:[#allocation10 + $0x64] sm:$0xf0] }
  0x30   :  { %v886_v25 = vor.u32 %v1013_v20, %v883_v22  ;;  %v1011_v26 = vld [vmem:[#allocation10 + $0x64] sm:$0xf]  ;;  %v875_v27 = vld [vmem:[#allocation10 + $0x68] sm:$0xf0]  ;;  %v874_v28 = vor.u32 %v1012_v24, %v873_v23  ;;  %v865_v30 = vld [vmem:[#allocation10 + $0x50] sm:$0xf] }
  0x31   :  { %242 = vmatpush.bf16.msra.mxu0 %v988_v4  ;;  %433 = vmatpush.bf16.msra.mxu2 %v882_v21  ;;  %v878_v29 = vor.u32 %v1011_v26, %v875_v27  ;;  %v1010_v31 = vld [vmem:[#allocation10 + $0x54] sm:$0xf0]  ;;  %v1009_v32 = vld [vmem:[#allocation10 + $0x54] sm:$0xf]  ;;  %v867_v33 = vld [vmem:[#allocation10 + $0x58] sm:$0xf0] }
  0x32   :  { %322 = vmatpush.bf16.msra.mxu1 %v996_v5  ;;  %446 = vmatpush.bf16.msra.mxu3 %v886_v25  ;;  %v866_v34 = vor.u32 %v1010_v31, %v865_v30  ;;  %v870_v35 = vor.u32 %v1009_v32, %v867_v33  ;;  %v857_v36 = vld [vmem:[#allocation10 + $0x40] sm:$0xf]  ;;  %v1008_v37 = vld [vmem:[#allocation10 + $0x44] sm:$0xf0]  ;;  %v1007_v38 = vld [vmem:[#allocation10 + $0x44] sm:$0xf] }
  0x33   :  { %v859_v39 = vld [vmem:[#allocation10 + $0x48] sm:$0xf0]  ;;  %v858_v40 = vor.u32 %v1008_v37, %v857_v36  ;;  %v849_v42 = vld [vmem:[#allocation10 + $0x30] sm:$0xf]  ;;  %v1006_v43 = vld [vmem:[#allocation10 + $0x34] sm:$0xf0] }
  0x34   :  { %v862_v41 = vor.u32 %v1007_v38, %v859_v39  ;;  %v1005_v44 = vld [vmem:[#allocation10 + $0x34] sm:$0xf]  ;;  %v851_v45 = vld [vmem:[#allocation10 + $0x38] sm:$0xf0]  ;;  %v850_v46 = vor.u32 %v1006_v43, %v849_v42  ;;  %v841_v48 = vld [vmem:[#allocation10 + $0x20] sm:$0xf] }
  0x35   :  { %243 = vmatpush.bf16.msra.mxu0 %v987_v6  ;;  %434 = vmatpush.bf16.msra.mxu2 %v874_v28  ;;  %v854_v47 = vor.u32 %v1005_v44, %v851_v45  ;;  %v1004_v49 = vld [vmem:[#allocation10 + $0x24] sm:$0xf0]  ;;  %v1003_v50 = vld [vmem:[#allocation10 + $0x24] sm:$0xf]  ;;  %v843_v51 = vld [vmem:[#allocation10 + $0x28] sm:$0xf0] }
  0x36   :  { %323 = vmatpush.bf16.msra.mxu1 %v995_v7  ;;  %447 = vmatpush.bf16.msra.mxu3 %v878_v29  ;;  %v1477_v52 = vld [vmem:[#allocation16] sm:$0x3f]  ;;  %v842_v53 = vor.u32 %v1004_v49, %v841_v48  ;;  %v846_v54 = vor.u32 %v1003_v50, %v843_v51  ;;  %v833_v61 = vld [vmem:[#allocation10 + $0x10] sm:$0xf]  ;;  %v1002_v62 = vld [vmem:[#allocation10 + $0x14] sm:$0xf0] }
  0x37   :  { %v191_v55 = vperm.slane %v1477_v52, 0  ;;  %v1001_v63 = vld [vmem:[#allocation10 + $0x14] sm:$0xf]  ;;  %v834_v0 = vor.u32 %v1002_v62, %v833_v61  ;;  %v835_v1 = vld [vmem:[#allocation10 + $0x18] sm:$0xf0]  ;;  %v1019_v18 = vld [vmem:[#allocation11 + $0x20] sm:$0xff] }
  0x38   :  { %v838_v2 = vor.u32 %v1001_v63, %v835_v1  ;;  %v825_v3 = vld [vmem:[#allocation10] sm:$0xf]  ;;  %v1000_v4 = vld [vmem:[#allocation10 + $0x4] sm:$0xf0]  ;;  %v999_v5 = vld [vmem:[#allocation10 + $0x4] sm:$0xf] }
  0x39   :  { %244 = vmatpush.bf16.msra.mxu0 %v986_v8  ;;  %435 = vmatpush.bf16.msra.mxu2 %v866_v34  ;;  %v826_v6 = vor.u32 %v1000_v4, %v825_v3  ;;  %v827_v7 = vld [vmem:[#allocation10 + $0x8] sm:$0xf0]  ;;  %v1018_v19 = vld [vmem:[#allocation11 + $0x18] sm:$0xff]  ;;  %v1017_v20 = vld [vmem:[#allocation11 + $0x10] sm:$0xff]  ;;  %v351_v27 = vperm.slane %v1477_v52, 2  ;;  %v562_v62 = vperm.slane %v1477_v52, 4 }
  0x3a   :  { %324 = vmatpush.bf16.msra.mxu1 %v994_v9  ;;  %448 = vmatpush.bf16.msra.mxu3 %v870_v35  ;;  %v830_v8 = vor.u32 %v999_v5, %v827_v7  ;;  %v1022_v9 = vld [vmem:[#allocation11 + $0x38] sm:$0xff]  ;;  %v1016_v21 = vld [vmem:[#allocation11 + $0x8] sm:$0xff]  ;;  %v1015_v22 = vld [vmem:[#allocation11] sm:$0xff]  ;;  %v642_v4 = vperm.slane %v1477_v52, 5 }
  0x3b   :  { %v1030_v23 = vld [vmem:[#allocation13 + $0x38] sm:$0xff]  ;;  %v1029_v24 = vld [vmem:[#allocation13 + $0x30] sm:$0xff]  ;;  %v172_v25 = vld [vmem:[#allocation16 + $0x8] sm:$0x3f] }
  0x3c   :  { %v1028_v26 = vld [vmem:[#allocation13 + $0x28] sm:$0xff]  ;;  %v352_v28 = vperm.slane %v172_v25, 2  ;;  %v1027_v29 = vld [vmem:[#allocation13 + $0x20] sm:$0xff]  ;;  %v1026_v34 = vld [vmem:[#allocation13 + $0x18] sm:$0xff] }
  0x3d   :  { %245 = vmatpush.bf16.msra.mxu0 %v985_v10  ;;  %436 = vmatpush.bf16.msra.mxu2 %v858_v40  ;;  %v1021_v10 = vld [vmem:[#allocation11 + $0x30] sm:$0xff]  ;;  %v459_v40 = vld [vmem:[#allocation5] sm:$0xff]  ;;  %v1024_v45 = vld [vmem:[#allocation13 + $0x8] sm:$0xff] }
  0x3e   :  { %325 = vmatpush.bf16.msra.mxu1 %v993_v11  ;;  %449 = vmatpush.bf16.msra.mxu3 %v862_v41  ;;  %v1020_v11 = vld [vmem:[#allocation11 + $0x28] sm:$0xff]  ;;  %v1025_v37 = vld [vmem:[#allocation13 + $0x10] sm:$0xff]  ;;  %v1035_v50 = vld [vmem:[#allocation14 + $0x20] sm:$0xff] }
  0x3f   :  { %v1037_v48 = vld [vmem:[#allocation14 + $0x30] sm:$0xff]  ;;  %v1036_v49 = vld [vmem:[#allocation14 + $0x28] sm:$0xff]  ;;  %v1034_v51 = vld [vmem:[#allocation14 + $0x18] sm:$0xff] }
  0x40   :  { %v1031_v61 = vld [vmem:[#allocation14] sm:$0xff] }
  0x41   :  { %246 = vmatpush.bf16.msra.mxu0 %v984_v12  ;;  %437 = vmatpush.bf16.msra.mxu2 %v850_v46  ;;  %v271_v12 = vperm.slane %v1477_v52, 1  ;;  %v1023_v46 = vld [vmem:[#allocation13] sm:$0xff] }
  0x42   :  { %326 = vmatpush.bf16.msra.mxu1 %v992_v16  ;;  %450 = vmatpush.bf16.msra.mxu3 %v854_v47  ;;  %v1038_v47 = vld [vmem:[#allocation14 + $0x38] sm:$0xff] }
  0x45   :  { %247 = vmatpush.bf16.msra.mxu0 %v983_v13  ;;  %438 = vmatpush.bf16.msra.mxu2 %v842_v53  ;;  %v1033_v53 = vld [vmem:[#allocation14 + $0x10] sm:$0xff] }
  0x46   :  { %327 = vmatpush.bf16.msra.mxu1 %v991_v17  ;;  %451 = vmatpush.bf16.msra.mxu3 %v846_v54  ;;  %v482_v54 = vperm.slane %v1477_v52, 3 }
  0x48   :  { %248 = vmatmul.bf16.vlgmr.msra.gmra.mxu0 %v190_v15 }
  0x49   :  { %439 = vmatpush.bf16.msra.mxu2 %v834_v0  ;;  %531 = vmatpush.bf16.msrb.mxu0 %v1022_v9 }
  0x4a   :  { %452 = vmatpush.bf16.msra.mxu3 %v838_v2  ;;  %611 = vmatpush.bf16.msrb.mxu1 %v1030_v23 }
  0x4d   :  { %440 = vmatpush.bf16.msra.mxu2 %v826_v6  ;;  %532 = vmatpush.bf16.msrb.mxu0 %v1021_v10 }
  0x4e   :  { %453 = vmatpush.bf16.msra.mxu3 %v830_v8  ;;  %612 = vmatpush.bf16.msrb.mxu1 %v1029_v24 }
  0x51   :  { %533 = vmatpush.bf16.msrb.mxu0 %v1020_v11  ;;  %691 = vmatpush.bf16.msrb.mxu2 %v1038_v47 }
  0x52   :  { %613 = vmatpush.bf16.msrb.mxu1 %v1028_v26 }
  0x55   :  { %534 = vmatpush.bf16.msrb.mxu0 %v1019_v18  ;;  %692 = vmatpush.bf16.msrb.mxu2 %v1037_v48 }
  0x56   :  { %614 = vmatpush.bf16.msrb.mxu1 %v1027_v29 }
  0x59   :  { %535 = vmatpush.bf16.msrb.mxu0 %v1018_v19  ;;  %693 = vmatpush.bf16.msrb.mxu2 %v1036_v49 }
  0x5a   :  { %615 = vmatpush.bf16.msrb.mxu1 %v1026_v34 }
  0x5d   :  { %536 = vmatpush.bf16.msrb.mxu0 %v1017_v20  ;;  %694 = vmatpush.bf16.msrb.mxu2 %v1035_v50 }
  0x5e   :  { %616 = vmatpush.bf16.msrb.mxu1 %v1025_v37 }
  0x61   :  { %537 = vmatpush.bf16.msrb.mxu0 %v1016_v21  ;;  %695 = vmatpush.bf16.msrb.mxu2 %v1034_v51 }
  0x62   :  { %617 = vmatpush.bf16.msrb.mxu1 %v1024_v45 }
  0x65   :  { %538 = vmatpush.bf16.msrb.mxu0 %v1015_v22  ;;  %696 = vmatpush.bf16.msrb.mxu2 %v1033_v53 }
  0x66   :  { %618 = vmatpush.bf16.msrb.mxu1 %v1023_v46 }
  0xc5   :  { %v249_v56 = vpop.f32.mrf.mxu0 }
  0xc6   :  { %v250_v57 = vadd.f32 %v249_v56, %v191_v55 }
  0xc8   :  { %v253_v58 = vmax.f32 %v250_v57, 0.0 }
  0xca   :  { %v270_v59 = vpack.c.bf16 %v253_v58, %v253_v58 }
  0xcc   :  { %328 = vmatmul.bf16.vlgmr.msra.gmra.mxu1 %v270_v59 }
  0xcd   :  { %v251_v60 = vpop.f32.mrf.mxu0 }
  0xce   :  { %v1032_v60 = vld [vmem:[#allocation14 + $0x8] sm:$0xff] }
  0xcf   :  { %697 = vmatpush.bf16.msrb.mxu2 %v1032_v60 }
  0xd3   :  { %698 = vmatpush.bf16.msrb.mxu2 %v1031_v61 }
 0x149   :  { %v329_v13 = vpop.f32.mrf.mxu1 }
 0x14a   :  { %v330_v14 = vadd.f32 %v329_v13, %v271_v12 }
 0x14c   :  { %v333_v15 = vmax.f32 %v330_v14, 0.0 }
 0x14e   :  { %v350_v16 = vpack.c.bf16 %v333_v15, %v333_v15 }
 0x150   :  { %441 = vmatmul.bf16.vlgmr.msra.gmra.mxu2 %v350_v16  ;;  %454 = vmatmul.bf16.vlgmr.msra.gmra.mxu3 %v350_v16 }
 0x151   :  { %v331_v17 = vpop.f32.mrf.mxu1 }
 0x1d3   :  { %v442_v30 = vpop.f32.mrf.mxu2  ;;  %v455_v31 = vpop.f32.mrf.mxu3 }
 0x1d4   :  { %v443_v32 = vadd.f32 %v442_v30, %v351_v27  ;;  %v456_v33 = vadd.f32 %v455_v31, %v352_v28 }
 0x1d6   :  { %705 = vst [vmem:[#allocation18] sm:$0xff] %v443_v32  ;;  %v460_v35 = vmul.f32 0.5, %v456_v33 }
 0x1d7   :  { %706 = vst [vmem:[#allocation20] sm:$0xff] %v456_v33  ;;  %728 = dma.vmem_to_hbm [thread:$0]  %s724_s7, 128, %s726_s1, [#allocation19]  }
 0x1d8   :  { %v461_v36 = vmul.f32 1.442695, %v460_v35  ;;  %739 = dma.vmem_to_hbm [thread:$0]  %s735_s21, 128, %s737_s24, [#allocation19]  }
 0x1da   :  { %1055 = vpow2.f32 %v461_v36 }
 0x1db   :  { %v444_v38 = vpop.f32.mrf.mxu2  ;;  %v457_v39 = vpop.f32.mrf.mxu3 }
 0x1e0   :  { %v1056_v41 = vpop.eup %1055 }
 0x1e1   :  { %v463_v42 = vmul.f32 %v1056_v41, %v459_v40 }
 0x1e3   :  { %v464_v43 = vadd.f32 %v463_v42, %v443_v32 }
 0x1e5   :  { %v481_v44 = vpack.c.bf16 %v464_v43, %v464_v43 }
 0x1e7   :  { %539 = vmatmul.bf16.vlgmr.msrb.gmra.mxu0 %v481_v44 }
 0x264   :  { %v540_v55 = vpop.f32.mrf.mxu0 }
 0x265   :  { %v541_v56 = vadd.f32 %v540_v55, %v482_v54 }
 0x267   :  { %v544_v57 = vmax.f32 %v541_v56, 0.0 }
 0x269   :  { %v561_v58 = vpack.c.bf16 %v544_v57, %v544_v57 }
 0x26b   :  { %619 = vmatmul.bf16.vlgmr.msrb.gmra.mxu1 %v561_v58 }
 0x26c   :  { %v542_v59 = vpop.f32.mrf.mxu0 }
 0x2e8   :  { %v620_v63 = vpop.f32.mrf.mxu1 }
 0x2e9   :  { %v621_v0 = vadd.f32 %v620_v63, %v562_v62 }
 0x2eb   :  { %v624_v1 = vmax.f32 %v621_v0, 0.0 }
 0x2ed   :  { %v641_v2 = vpack.c.bf16 %v624_v1, %v624_v1 }
 0x2ef   :  { %699 = vmatmul.bf16.vlgmr.msrb.gmra.mxu2 %v641_v2 }
 0x2f0   :  { %v622_v3 = vpop.f32.mrf.mxu1 }
 0x372   :  { %v700_v5 = vpop.f32.mrf.mxu2 }
 0x373   :  { %v701_v6 = vadd.f32 %v700_v5, %v642_v4 }
 0x375   :  { %704 = vst [vmem:[#allocation17] sm:$0xff] %v701_v6 }
 0x376   :  { %717 = dma.vmem_to_hbm [thread:$0]  %s713_s26, 128, %s715_s0, [#allocation4]  }
 0x37a   :  { %v702_v7 = vpop.f32.mrf.mxu2 }
 0x37b   :  { %1355 = dma.done.wait [#allocation4], 128  }
 0x37c   :  { %1356 = vsyncadd [#allocation4], 4294967168 }
 0x37d   :  { %1357 = dma.done.wait [#allocation19], 256  }
 0x37e   :  { %1358 = vsyncadd [#allocation19], 4294967040 }
 0x37f   :  { %752 = vsyncpa [#allocation3], 1 }
 0x380   :  { %753 = vsyncpa [#allocation6], 1 }
 0x381   :  { %754 = vsyncpa [#allocation9], 1 }
 0x382   :  { %755 = vsyncpa [#allocation12], 1 }
 0x383   :  { %756 = vsyncpa [#allocation15], 1 }
 0x384   :  { %757 = vsyncpa [#allocation4], 1 }
 0x385   :  { %758 = vsyncpa [#allocation19], 1 }

</bundles_post_ra>
